<compile_context>
chip_gen: v7x
topology: tpu7x:2x2x1
jax: 0.10.0
libtpu: 0.0.40
codegen_flags: <defaults>
</compile_context>

<pallas_src>
import jax
import jax.numpy as jnp
from jax.experimental import pallas as pl
from jax.experimental.pallas import tpu as pltpu

EPS = 1e-5          # nn.InstanceNorm1d default eps
NEG_SLOPE = 0.01    # nn.LeakyReLU default negative_slope
K = 4               # Conv1d kernel size
STRIDE = 2
PAD = 1


def _vmem():
    # whole-array block resident in VMEM (all operands here are tiny)
    return pl.BlockSpec(memory_space=pltpu.MemorySpace.VMEM)


# ------------------------------ fused kernel --------------------------------

def fused_classifier_kernel(x_ref, wf1_ref, wf2_ref, wh_ref, bh_ref, wc_ref,
                            noise_ref, o_ref):
    """Whole Classifier.forward in one VMEM-resident kernel.

    x_ref:    (B, L, C_in)                input, NLC layout
    wf1_ref:  (L*C_in,  L1*32)            folded Conv1d(i_c,32,k4,s2,p1)
    wf2_ref:  (L1*32,   L2*64)            folded Conv1d(32,64,k4,s2,p1)
    wh_ref:   (L2*64, n_class+n_latent)   fused head: [ Wm@Wc | Wv ], rows in (l,c) order
    bh_ref:   (1, n_class+n_latent)       fused head bias: [ bm@Wc + bc | bv ]
    wc_ref:   (n_latent, n_class)         classifier weight (for the noise path)
    noise_ref:(B, n_latent)               stands in for torch.randn_like in _sample_z
    o_ref:    (B, n_class)                logits (only HBM output)
    """
    f32 = jnp.float32
    B = x_ref.shape[0]
    n_class = o_ref.shape[1]

    def inorm(y):
        # InstanceNorm1d (affine=False): normalize over spatial axis per (b, c).
        # Single-pass stats: mean and mean-of-squares together (one fewer
        # cross-sublane reduction per norm); biased variance like PyTorch.
        m = jnp.mean(y, axis=1, keepdims=True)
        ms = jnp.mean(y * y, axis=1, keepdims=True)
        v = jnp.maximum(ms - m * m, 0.0)
        return (y - m) * jax.lax.rsqrt(v + EPS)

    def lrelu(y):
        return jnp.where(y >= 0, y, NEG_SLOPE * y)

    # encoder[0]: InstanceNorm1d(i_c)
    h = inorm(x_ref[...])                                          # (B, L, C_in)

    # encoder[1..3]: Conv1d + [bias cancelled by IN] + IN + LeakyReLU
    # strided conv == one lane-dense matmul against the pre-folded weight
    y1 = jnp.dot(h.reshape(B, -1), wf1_ref[...], preferred_element_type=f32)
    h = lrelu(inorm(y1.reshape(B, wf1_ref.shape[1] // 32, 32)))    # (B, L/2, 32)

    # encoder[4..6]
    y2 = jnp.dot(h.reshape(B, -1), wf2_ref[...], preferred_element_type=f32)
    h = lrelu(inorm(y2.reshape(B, wf2_ref.shape[1] // 64, 64)))    # (B, L/4, 64)

    # fused head: one matmul emits [ mu@Wc + bm@Wc + bc | log_var ]
    head = jnp.dot(h.reshape(B, -1), wh_ref[...],
                   preferred_element_type=f32) + bh_ref[...]
    mu_c = head[:, :n_class]
    log_var = head[:, n_class:]

    # reparameterization + classifier (mu path already folded into the head)
    zn = jnp.exp(0.5 * log_var) * noise_ref[...]
    o_ref[...] = mu_c + jnp.dot(zn, wc_ref[...], preferred_element_type=f32)


# ------------------------------ JAX wrapper ---------------------------------

def _tap_selectors(l_in, l_out):
    # T[t, l, p] = 1 iff input position p feeds tap t of output position l,
    # i.e. p == STRIDE*l + t - PAD (out-of-range -> all-zero == zero padding).
    t_idx = jnp.arange(K)[:, None, None]
    l_idx = jnp.arange(l_out)[None, :, None]
    p_idx = jnp.arange(l_in)[None, None, :]
    return (p_idx == STRIDE * l_idx + t_idx - PAD).astype(jnp.float32)


def _fold_conv(w, l_in, l_out):
    # Wf[(p,ci),(l,co)] = sum_t [p == 2l + t - 1] * w[co, ci, t]
    t = _tap_selectors(l_in, l_out)                       # (K, l_out, l_in)
    wf = jnp.einsum('tlp,oit->pilo', t, w)                # (l_in, ci, l_out, co)
    return wf.reshape(l_in * w.shape[1], l_out * w.shape[0])


@jax.jit
def classifier_forward(x, noise, params):
    """Classifier.forward: VAE.encode -> _sample_z -> Linear, as one kernel."""
    B, c_in, L = x.shape
    assert L % 4 == 0
    L1, L2 = L // 2, L // 4
    n_class = params["bc"].shape[0]
    f32 = jnp.float32

    # one-time layout prep (constant-folded / fused by XLA under jit)
    x_nlc = jnp.transpose(x, (0, 2, 1)).astype(f32)                 # (B, L, C_in)

    # folded conv weights; conv biases are dropped (cancelled by InstanceNorm)
    wf1 = _fold_conv(params["w1"].astype(f32), L, L1)               # (L*c_in, L1*32)
    wf2 = _fold_conv(params["w2"].astype(f32), L1, L2)              # (L1*32, L2*64)

    # fused head: permute rows from torch's .view(B,-1) order (c*L2 + l) to the
    # kernel's (l*64 + c) order, and fold the classifier into the mu path.
    def perm(w):
        return w.reshape(64, L2, -1).transpose(1, 0, 2).reshape(64 * L2, -1)
    wm_p, wv_p = perm(params["wm"]), perm(params["wv"])
    wh = jnp.concatenate([wm_p @ params["wc"], wv_p], axis=1)       # (L2*64, nc+nl)
    bh = jnp.concatenate([params["bm"] @ params["wc"] + params["bc"],
                          params["bv"]])[None, :]                   # (1, nc+nl)

    # TODO(synk): on v7x only, add a batch grid axis with
    # dimension_semantics=("parallel",) once B grows enough to split across the
    # two TensorCores; at these sizes a single grid-less call is optimal.
    return pl.pallas_call(
        fused_classifier_kernel,
        out_shape=jax.ShapeDtypeStruct((B, n_class), f32),
        in_specs=[_vmem()] * 7,
        out_specs=_vmem(),
    )(x_nlc, wf1, wf2, wh, bh, params["wc"], noise)


# ------------------------- deterministic parameters --------------------------

def init_params(key, i_c, n_latent, z_dim, n_class):
    ks = jax.random.split(key, 10)
    s = 0.1
    feat = 64 * z_dim
    return {
        # Conv1d(i_c, 32, 4) / Conv1d(32, 64, 4): (out, in, k) like PyTorch
        "w1": s * jax.random.normal(ks[0], (32, i_c, 4), jnp.float32),
        "b1": s * jax.random.normal(ks[1], (32,), jnp.float32),
        "w2": s * jax.random.normal(ks[2], (64, 32, 4), jnp.float32),
        "b2": s * jax.random.normal(ks[3], (64,), jnp.float32),
        # Linear weights stored already transposed as (in_features, out_features)
        "wm": s * jax.random.normal(ks[4], (feat, n_latent), jnp.float32),
        "bm": s * jax.random.normal(ks[5], (n_latent,), jnp.float32),
        "wv": s * jax.random.normal(ks[6], (feat, n_latent), jnp.float32),
        "bv": s * jax.random.normal(ks[7], (n_latent,), jnp.float32),
        "wc": s * jax.random.normal(ks[8], (n_latent, n_class), jnp.float32),
        "bc": s * jax.random.normal(ks[9], (n_class,), jnp.float32),
    }


# ------------------------------ pure-JAX reference ---------------------------

def reference_forward(x, noise, params):
    hi = jax.lax.Precision.HIGHEST

    def inorm(a):
        m = jnp.mean(a, axis=-1, keepdims=True)
        v = jnp.mean((a - m) ** 2, axis=-1, keepdims=True)
        return (a - m) * jax.lax.rsqrt(v + EPS)

    def lrelu(a):
        return jnp.where(a >= 0, a, NEG_SLOPE * a)

    def conv1d(a, w, b, stride, pad):
        o = jax.lax.conv_general_dilated(a, w, (stride,), [(pad, pad)],
                                         dimension_numbers=("NCH", "OIH", "NCH"),
                                         precision=hi)
        return o + b[None, :, None]

    h = inorm(x)
    h = lrelu(inorm(conv1d(h, params["w1"], params["b1"], 2, 1)))
    h = lrelu(inorm(conv1d(h, params["w2"], params["b2"], 2, 1)))
    f = h.reshape(h.shape[0], -1)
    mu = jnp.dot(f, params["wm"], precision=hi) + params["bm"]
    lv = jnp.dot(f, params["wv"], precision=hi) + params["bv"]
    z = jnp.exp(0.5 * lv) * noise + mu
    return jnp.dot(z, params["wc"], precision=hi) + params["bc"]


# ----------------------------------- main ------------------------------------

if __name__ == "__main__":
    B, i_c, L = 2, 4, 16          # input length 16 -> conv stack gives z_dim = 4
    n_latent, n_class = 32, 5
    z_dim = L // 4

    key = jax.random.PRNGKey(0)
    kx, kn, kp = jax.random.split(key, 3)
    x = jax.random.normal(kx, (B, i_c, L), jnp.float32)
    # stands in for torch.randn_like inside VAE._sample_z (deterministic here)
    noise = jax.random.normal(kn, (B, n_latent), jnp.float32)
    params = init_params(kp, i_c, n_latent, z_dim, n_class)

    logits = jax.block_until_ready(classifier_forward(x, noise, params))
    ref = jax.block_until_ready(reference_forward(x, noise, params))

    assert logits.shape == (B, n_class)
    assert jnp.allclose(logits, ref, rtol=1e-3, atol=2e-3), (logits, ref)
    print("KERNEL_OK")
</pallas_src>

<mosaic_0001>
module attributes {stable_mosaic.version = 11 : i64} {
  func.func @fused_classifier_kernel(%arg0: memref<2x16x4xf32, #tpu.memory_space<vmem>>, %arg1: memref<64x256xf32, #tpu.memory_space<vmem>>, %arg2: memref<256x256xf32, #tpu.memory_space<vmem>>, %arg3: memref<256x37xf32, #tpu.memory_space<vmem>>, %arg4: memref<1x37xf32, #tpu.memory_space<vmem>>, %arg5: memref<32x5xf32, #tpu.memory_space<vmem>>, %arg6: memref<2x32xf32, #tpu.memory_space<vmem>>, %arg7: memref<2x5xf32, #tpu.memory_space<vmem>>) attributes {dimension_semantics = [], scalar_prefetch = 0 : i64, scratch_operands = 0 : i64, tpu.core_type = #tpu.core_type<tc>} {
    %c0 = arith.constant 0 : index
    %c0_0 = arith.constant 0 : index
    %c0_1 = arith.constant 0 : index
    %0 = vector.load %arg0[%c0, %c0_0, %c0_1] : memref<2x16x4xf32, #tpu.memory_space<vmem>>, vector<2x16x4xf32>
    %cst = arith.constant dense<0.000000e+00> : vector<2x4xf32>
    %1 = vector.multi_reduction <add>, %0, %cst [1] : vector<2x16x4xf32> to vector<2x4xf32>
    %2 = vector.shape_cast %1 : vector<2x4xf32> to vector<2x1x4xf32>
    %cst_2 = arith.constant 1.600000e+01 : f32
    %3 = vector.broadcast %cst_2 : f32 to vector<2x1x4xf32>
    %4 = arith.divf %2, %3 : vector<2x1x4xf32>
    %5 = arith.mulf %0, %0 : vector<2x16x4xf32>
    %cst_3 = arith.constant dense<0.000000e+00> : vector<2x4xf32>
    %6 = vector.multi_reduction <add>, %5, %cst_3 [1] : vector<2x16x4xf32> to vector<2x4xf32>
    %7 = vector.shape_cast %6 : vector<2x4xf32> to vector<2x1x4xf32>
    %cst_4 = arith.constant 1.600000e+01 : f32
    %8 = vector.broadcast %cst_4 : f32 to vector<2x1x4xf32>
    %9 = arith.divf %7, %8 : vector<2x1x4xf32>
    %10 = arith.mulf %4, %4 : vector<2x1x4xf32>
    %11 = arith.subf %9, %10 : vector<2x1x4xf32>
    %cst_5 = arith.constant 0.000000e+00 : f32
    %12 = vector.broadcast %cst_5 : f32 to vector<2x1x4xf32>
    %13 = arith.maximumf %11, %12 : vector<2x1x4xf32>
    %14 = vector.broadcast %4 : vector<2x1x4xf32> to vector<2x16x4xf32>
    %15 = arith.subf %0, %14 : vector<2x16x4xf32>
    %cst_6 = arith.constant 9.99999974E-6 : f32
    %16 = vector.broadcast %cst_6 : f32 to vector<2x1x4xf32>
    %17 = arith.addf %13, %16 : vector<2x1x4xf32>
    %18 = math.rsqrt %17 : vector<2x1x4xf32>
    %19 = vector.broadcast %18 : vector<2x1x4xf32> to vector<2x16x4xf32>
    %20 = arith.mulf %15, %19 : vector<2x16x4xf32>
    %21 = vector.shape_cast %20 : vector<2x16x4xf32> to vector<2x64xf32>
    %c0_7 = arith.constant 0 : index
    %c0_8 = arith.constant 0 : index
    %22 = vector.load %arg1[%c0_7, %c0_8] : memref<64x256xf32, #tpu.memory_space<vmem>>, vector<64x256xf32>
    %cst_9 = arith.constant dense<0.000000e+00> : vector<2x256xf32>
    %23 = tpu.matmul %21, %22, %cst_9 {dimension_numbers = #tpu.dot_dimension_numbers<[1], [0], [0], [1], [0, 0, 1, 1], [], []>} : vector<2x64xf32>, vector<64x256xf32>, vector<2x256xf32> -> vector<2x256xf32>
    %24 = vector.shape_cast %23 : vector<2x256xf32> to vector<2x8x32xf32>
    %cst_10 = arith.constant dense<0.000000e+00> : vector<2x32xf32>
    %25 = vector.multi_reduction <add>, %24, %cst_10 [1] : vector<2x8x32xf32> to vector<2x32xf32>
    %26 = vector.shape_cast %25 : vector<2x32xf32> to vector<2x1x32xf32>
    %cst_11 = arith.constant 8.000000e+00 : f32
    %27 = vector.broadcast %cst_11 : f32 to vector<2x1x32xf32>
    %28 = arith.divf %26, %27 : vector<2x1x32xf32>
    %29 = arith.mulf %24, %24 : vector<2x8x32xf32>
    %cst_12 = arith.constant dense<0.000000e+00> : vector<2x32xf32>
    %30 = vector.multi_reduction <add>, %29, %cst_12 [1] : vector<2x8x32xf32> to vector<2x32xf32>
    %31 = vector.shape_cast %30 : vector<2x32xf32> to vector<2x1x32xf32>
    %cst_13 = arith.constant 8.000000e+00 : f32
    %32 = vector.broadcast %cst_13 : f32 to vector<2x1x32xf32>
    %33 = arith.divf %31, %32 : vector<2x1x32xf32>
    %34 = arith.mulf %28, %28 : vector<2x1x32xf32>
    %35 = arith.subf %33, %34 : vector<2x1x32xf32>
    %cst_14 = arith.constant 0.000000e+00 : f32
    %36 = vector.broadcast %cst_14 : f32 to vector<2x1x32xf32>
    %37 = arith.maximumf %35, %36 : vector<2x1x32xf32>
    %38 = vector.broadcast %28 : vector<2x1x32xf32> to vector<2x8x32xf32>
    %39 = arith.subf %24, %38 : vector<2x8x32xf32>
    %cst_15 = arith.constant 9.99999974E-6 : f32
    %40 = vector.broadcast %cst_15 : f32 to vector<2x1x32xf32>
    %41 = arith.addf %37, %40 : vector<2x1x32xf32>
    %42 = math.rsqrt %41 : vector<2x1x32xf32>
    %43 = vector.broadcast %42 : vector<2x1x32xf32> to vector<2x8x32xf32>
    %44 = arith.mulf %39, %43 : vector<2x8x32xf32>
    %cst_16 = arith.constant 0.000000e+00 : f32
    %45 = vector.broadcast %cst_16 : f32 to vector<2x8x32xf32>
    %46 = arith.cmpf oge, %44, %45 : vector<2x8x32xf32>
    %cst_17 = arith.constant 0.00999999977 : f32
    %47 = vector.broadcast %cst_17 : f32 to vector<2x8x32xf32>
    %48 = arith.mulf %47, %44 : vector<2x8x32xf32>
    %49 = arith.select %46, %44, %48 : vector<2x8x32xi1>, vector<2x8x32xf32>
    %50 = vector.shape_cast %49 : vector<2x8x32xf32> to vector<2x256xf32>
    %c0_18 = arith.constant 0 : index
    %c0_19 = arith.constant 0 : index
    %51 = vector.load %arg2[%c0_18, %c0_19] : memref<256x256xf32, #tpu.memory_space<vmem>>, vector<256x256xf32>
    %cst_20 = arith.constant dense<0.000000e+00> : vector<2x256xf32>
    %52 = tpu.matmul %50, %51, %cst_20 {dimension_numbers = #tpu.dot_dimension_numbers<[1], [0], [0], [1], [0, 0, 1, 1], [], []>} : vector<2x256xf32>, vector<256x256xf32>, vector<2x256xf32> -> vector<2x256xf32>
    %53 = vector.shape_cast %52 : vector<2x256xf32> to vector<2x4x64xf32>
    %cst_21 = arith.constant dense<0.000000e+00> : vector<2x64xf32>
    %54 = vector.multi_reduction <add>, %53, %cst_21 [1] : vector<2x4x64xf32> to vector<2x64xf32>
    %55 = vector.shape_cast %54 : vector<2x64xf32> to vector<2x1x64xf32>
    %cst_22 = arith.constant 4.000000e+00 : f32
    %56 = vector.broadcast %cst_22 : f32 to vector<2x1x64xf32>
    %57 = arith.divf %55, %56 : vector<2x1x64xf32>
    %58 = arith.mulf %53, %53 : vector<2x4x64xf32>
    %cst_23 = arith.constant dense<0.000000e+00> : vector<2x64xf32>
    %59 = vector.multi_reduction <add>, %58, %cst_23 [1] : vector<2x4x64xf32> to vector<2x64xf32>
    %60 = vector.shape_cast %59 : vector<2x64xf32> to vector<2x1x64xf32>
    %cst_24 = arith.constant 4.000000e+00 : f32
    %61 = vector.broadcast %cst_24 : f32 to vector<2x1x64xf32>
    %62 = arith.divf %60, %61 : vector<2x1x64xf32>
    %63 = arith.mulf %57, %57 : vector<2x1x64xf32>
    %64 = arith.subf %62, %63 : vector<2x1x64xf32>
    %cst_25 = arith.constant 0.000000e+00 : f32
    %65 = vector.broadcast %cst_25 : f32 to vector<2x1x64xf32>
    %66 = arith.maximumf %64, %65 : vector<2x1x64xf32>
    %67 = vector.broadcast %57 : vector<2x1x64xf32> to vector<2x4x64xf32>
    %68 = arith.subf %53, %67 : vector<2x4x64xf32>
    %cst_26 = arith.constant 9.99999974E-6 : f32
    %69 = vector.broadcast %cst_26 : f32 to vector<2x1x64xf32>
    %70 = arith.addf %66, %69 : vector<2x1x64xf32>
    %71 = math.rsqrt %70 : vector<2x1x64xf32>
    %72 = vector.broadcast %71 : vector<2x1x64xf32> to vector<2x4x64xf32>
    %73 = arith.mulf %68, %72 : vector<2x4x64xf32>
    %cst_27 = arith.constant 0.000000e+00 : f32
    %74 = vector.broadcast %cst_27 : f32 to vector<2x4x64xf32>
    %75 = arith.cmpf oge, %73, %74 : vector<2x4x64xf32>
    %cst_28 = arith.constant 0.00999999977 : f32
    %76 = vector.broadcast %cst_28 : f32 to vector<2x4x64xf32>
    %77 = arith.mulf %76, %73 : vector<2x4x64xf32>
    %78 = arith.select %75, %73, %77 : vector<2x4x64xi1>, vector<2x4x64xf32>
    %79 = vector.shape_cast %78 : vector<2x4x64xf32> to vector<2x256xf32>
    %c0_29 = arith.constant 0 : index
    %c0_30 = arith.constant 0 : index
    %80 = vector.load %arg3[%c0_29, %c0_30] : memref<256x37xf32, #tpu.memory_space<vmem>>, vector<256x37xf32>
    %cst_31 = arith.constant dense<0.000000e+00> : vector<2x37xf32>
    %81 = tpu.matmul %79, %80, %cst_31 {dimension_numbers = #tpu.dot_dimension_numbers<[1], [0], [0], [1], [0, 0, 1, 1], [], []>} : vector<2x256xf32>, vector<256x37xf32>, vector<2x37xf32> -> vector<2x37xf32>
    %c0_32 = arith.constant 0 : index
    %c0_33 = arith.constant 0 : index
    %82 = vector.load %arg4[%c0_32, %c0_33] : memref<1x37xf32, #tpu.memory_space<vmem>>, vector<1x37xf32>
    %83 = vector.broadcast %82 : vector<1x37xf32> to vector<2x37xf32>
    %84 = arith.addf %81, %83 : vector<2x37xf32>
    %85 = vector.extract_strided_slice %84 {offsets = [0, 0], sizes = [2, 5], strides = [1, 1]} : vector<2x37xf32> to vector<2x5xf32>
    %86 = vector.extract_strided_slice %84 {offsets = [0, 5], sizes = [2, 32], strides = [1, 1]} : vector<2x37xf32> to vector<2x32xf32>
    %cst_34 = arith.constant 5.000000e-01 : f32
    %87 = vector.broadcast %cst_34 : f32 to vector<2x32xf32>
    %88 = arith.mulf %87, %86 : vector<2x32xf32>
    %89 = math.exp %88 : vector<2x32xf32>
    %c0_35 = arith.constant 0 : index
    %c0_36 = arith.constant 0 : index
    %90 = vector.load %arg6[%c0_35, %c0_36] : memref<2x32xf32, #tpu.memory_space<vmem>>, vector<2x32xf32>
    %91 = arith.mulf %89, %90 : vector<2x32xf32>
    %c0_37 = arith.constant 0 : index
    %c0_38 = arith.constant 0 : index
    %92 = vector.load %arg5[%c0_37, %c0_38] : memref<32x5xf32, #tpu.memory_space<vmem>>, vector<32x5xf32>
    %cst_39 = arith.constant dense<0.000000e+00> : vector<2x5xf32>
    %93 = tpu.matmul %91, %92, %cst_39 {dimension_numbers = #tpu.dot_dimension_numbers<[1], [0], [0], [1], [0, 0, 1, 1], [], []>} : vector<2x32xf32>, vector<32x5xf32>, vector<2x5xf32> -> vector<2x5xf32>
    %94 = arith.addf %85, %93 : vector<2x5xf32>
    %c0_40 = arith.constant 0 : index
    %c0_41 = arith.constant 0 : index
    %95 = vector.load %arg7[%c0_40, %c0_41] : memref<2x5xf32, #tpu.memory_space<vmem>>, vector<2x5xf32>
    tpu.vector_store %arg7[%c0_40, %c0_41], %94 {strides = array<i32>} : memref<2x5xf32, #tpu.memory_space<vmem>>, vector<2x5xf32>,
    return
  }
}

</mosaic_0001>

<bundles_post_ra>
// kernel: classifier_forward.1
= control target key start
LH: loop header
LB: loop body
LE: loop exit
PB: predicated region body
PF: predicated region fallthrough
CT: control target
= control target key end

     0   :  { %vm31_vm0 = vcmask 31744   ;;  %v1364_v8 = vmov 0.0   ;;  %s1954_s0 = inlined_call_operand.vmem [shape: f32[2,16,4], index: 0, kind: input, shape index: {}]   ;;  %s1955_s1 = inlined_call_operand.vmem [shape: f32[64,256], index: 1, kind: input, shape index: {}]   ;;  %s1956_s2 = inlined_call_operand.vmem [shape: f32[256,256], index: 2, kind: input, shape index: {}]   ;;  %s1957_s3 = inlined_call_operand.vmem [shape: f32[256,37], index: 3, kind: input, shape index: {}]   ;;  %s1958_s4 = inlined_call_operand.vmem [shape: f32[1,37], index: 4, kind: input, shape index: {}]   ;;  %s1959_s5 = inlined_call_operand.vmem [shape: f32[32,5], index: 5, kind: input, shape index: {}]   ;;  %s1960_s6 = inlined_call_operand.vmem [shape: f32[2,32], index: 6, kind: input, shape index: {}]   ;;  %s1961_s7 = inlined_call_operand.hbm [shape: f32[2,5], index: 7, kind: output, shape index: {}]  }
   0x1   :  { %v1432_v0 = vld [vmem:[%s1954_s0] sm:$0xff]  ;;  %v1437_v1 = vld [vmem:[%s1954_s0 + $0x8] sm:$0xff]  ;;  %v1442_v2 = vld [vmem:[%s1954_s0 + $0x10] sm:$0xff]  ;;  %400 = vmatprep.mubr.f32.mxu0 %v1364_v8 }
   0x2   :  { %v1447_v3 = vld [vmem:[%s1954_s0 + $0x18] sm:$0xff]  ;;  %v32_v4 = vsel %vm31_vm0, %v1432_v0, 0.0  ;;  %v33_v5 = vsel %vm31_vm0, %v1437_v1, 0.0  ;;  %v41_v6 = vsel %vm31_vm0, %v1442_v2, 0.0  ;;  %v53_v7 = vmul.f32 %v1432_v0, %v1432_v0 }
   0x3   :  { %v34_v9 = vadd.f32 %v33_v5, %v32_v4  ;;  %v42_v10 = vsel %vm31_vm0, %v1447_v3, 0.0  ;;  %v54_v11 = vmul.f32 %v1437_v1, %v1437_v1  ;;  %v55_v12 = vmul.f32 %v1442_v2, %v1442_v2 }
   0x4   :  { %12 = vsyncpa [#allocation3], 0  ;;  %v43_v13 = vadd.f32 %v42_v10, %v41_v6  ;;  %v56_v14 = vmul.f32 %v1447_v3, %v1447_v3  ;;  %v57_v15 = vsel %vm31_vm0, %v53_v7, 0.0  ;;  %v1365_v57 = vmov 1983009808   ;;  %s1367_s16 = smov 32  }
   0x5   :  { %v35_v16 = vrot.slane %v34_v9, 4  ;;  %v58_v17 = vsel %vm31_vm0, %v54_v11, 0.0  ;;  %v66_v18 = vsel %vm31_vm0, %v55_v12, 0.0  ;;  %v97_v58 = vunpack.c.l.s4 %v1365_v57  ;;  %s1368_s17 = smov 8   ;;  %s1369_s26 = smov 40  }
   0x6   :  { %v44_v19 = vrot.slane %v43_v13, 4  ;;  %v59_v20 = vadd.f32 %v58_v17, %v57_v15  ;;  %v67_v21 = vsel %vm31_vm0, %v56_v14, 0.0  ;;  %v99_v59 = vlaneseq  ;;  %s1370_s27 = smov 4   ;;  %s1371_s12 = smov 12  }
   0x7   :  { %v36_v22 = vadd.f32 %v35_v16, %v34_v9  ;;  %v68_v23 = vadd.f32 %v67_v21, %v66_v18  ;;  %v98_v60 = vunpack.c.0.s8 %v97_v58  ;;  %v1366_v62 = vmov 1934713408   ;;  %s1372_s13 = smov 36   ;;  %v329_v58 = vld [vmem:[%s1955_s1 + $0x68] sm:$0xff]  ;;  %s1373_s23 = smov 44  }
   0x8   :  { %v45_v24 = vadd.f32 %v44_v19, %v43_v13  ;;  %v60_v25 = vrot.slane %v59_v20, 4  ;;  %v100_v61 = vshrl.u32 %v99_v59, 7  ;;  %v128_v63 = vunpack.c.l.s4 %v1366_v62  ;;  %v331_v59 = vld [vmem:[%s1955_s1 + $0x78] sm:$0xff]  ;;  %v328_v62 = vld [vmem:[%s1955_s1 + $0x60] sm:$0xff]  ;;  %s1374_s24 = smov 16   ;;  %s1375_s25 = smov 20  }
   0x9   :  { %v37_v26 = vrot.slane %v36_v22, 2  ;;  %v69_v27 = vrot.slane %v68_v23, 4  ;;  %s1379_s28 = smov 52   ;;  %s1380_s29 = smov 56   ;;  %vm288_vm1 = vcmask 64512   ;;  %vm290_vm2 = vcmask 97280  }
   0xa   :  { %v46_v28 = vrot.slane %v45_v24, 2  ;;  %v61_v29 = vadd.f32 %v60_v25, %v59_v20  ;;  %v1474_v9 = vsub.s32 %v98_v60, %v100_v61  ;;  %v129_v11 = vunpack.c.0.s8 %v128_v63  ;;  %v330_v63 = vld [vmem:[%s1955_s1 + $0x70] sm:$0xff]  ;;  %s1381_s30 = smov 60   ;;  %s1382_s8 = smov 64  }
   0xb   :  { %v38_v30 = vadd.f32 %v37_v26, %v36_v22  ;;  %v70_v31 = vadd.f32 %v69_v27, %v68_v23  ;;  %v317_v27 = vld [vmem:[%s1955_s1 + $0x8] sm:$0xff]  ;;  %vm292_vm3 = vcmask 130048   ;;  %vm294_vm4 = vcmask 162816   ;;  %s1383_s0 = smov 96   ;;  %s1384_s19 = smov 5  }
   0xc   :  { %v47_v32 = vadd.f32 %v46_v28, %v45_v24  ;;  %v62_v33 = vrot.slane %v61_v29, 2  ;;  %vm296_vm5 = vcmask 195584   ;;  %vm298_vm6 = vcmask 228352  }
   0xd   :  { %v39_v34 = vrot.slane %v38_v30, 1  ;;  %v71_v35 = vrot.slane %v70_v31, 2  ;;  %vm300_vm7 = vcmask 261120   ;;  %vm302_vm8 = vcmask 293888  }
   0xe   :  { %v48_v36 = vrot.slane %v47_v32, 1  ;;  %v63_v37 = vadd.f32 %v62_v33, %v61_v29  ;;  %vm304_vm9 = vcmask 326656   ;;  %vm306_vm10 = vcmask 359424  }
   0xf   :  { %v40_v38 = vadd.f32 %v39_v34, %v38_v30  ;;  %v72_v39 = vadd.f32 %v71_v35, %v70_v31  ;;  %v319_v30 = vld [vmem:[%s1955_s1 + $0x18] sm:$0xff]  ;;  %v316_v31 = vld [vmem:[%s1955_s1] sm:$0xff]  ;;  %v321_v35 = vld [vmem:[%s1955_s1 + $0x28] sm:$0xff]  ;;  %vm308_vm11 = vcmask 392192   ;;  %vm310_vm12 = vcmask 424960  }
  0x10   :  { %v49_v40 = vadd.f32 %v48_v36, %v47_v32  ;;  %v64_v41 = vrot.slane %v63_v37, 1  ;;  %v318_v32 = vld [vmem:[%s1955_s1 + $0x10] sm:$0xff]  ;;  %v323_v36 = vld [vmem:[%s1955_s1 + $0x38] sm:$0xff]  ;;  %vm312_vm13 = vcmask 457728   ;;  %vm314_vm14 = vcmask 490496  }
  0x11   :  { %v51_v42 = vmul.f32 0.0625, %v40_v38  ;;  %v73_v43 = vrot.slane %v72_v39, 1  ;;  %v1165_v38 = vpack.c.bf16 %v318_v32, %v316_v31  ;;  %vm332_vm15 = vcmask 523264  }
  0x12   :  { %v52_v44 = vmul.f32 0.0625, %v49_v40  ;;  %v65_v45 = vadd.f32 %v64_v41, %v63_v37  ;;  %v1163_v37 = vpack.c.bf16 %v319_v30, %v317_v27 }
  0x13   :  { %v74_v46 = vadd.f32 %v73_v43, %v72_v39  ;;  %v77_v47 = vmul.f32 %v51_v42, %v51_v42  ;;  %v84_v4 = vsub.f32 %v1437_v1, %v51_v42  ;;  %v83_v5 = vsub.f32 %v1432_v0, %v51_v42  ;;  %v320_v42 = vld [vmem:[%s1955_s1 + $0x20] sm:$0xff]  ;;  %v322_v43 = vld [vmem:[%s1955_s1 + $0x30] sm:$0xff] }
  0x14   :  { %v75_v48 = vmul.f32 0.0625, %v65_v45  ;;  %v78_v49 = vmul.f32 %v52_v44, %v52_v44  ;;  %v86_v6 = vsub.f32 %v1447_v3, %v52_v44  ;;  %v85_v7 = vsub.f32 %v1442_v2, %v52_v44  ;;  %1164 = vmatprep.subr.bf16.mxu0 %v1163_v37 }
  0x15   :  { %v76_v50 = vmul.f32 0.0625, %v74_v46  ;;  %v1478_v1 = vsub.s32 %v129_v11, %v100_v61  ;;  %v1167_v46 = vpack.c.bf16 %v323_v36, %v321_v35  ;;  %1166 = vmatpush1.bf16.msra.mxu0 %v1165_v38  ;;  %v1175_v61 = vpack.c.bf16 %v331_v59, %v329_v58 }
  0x16   :  { %v79_v51 = vsub.f32 %v75_v48, %v77_v47  ;;  %v325_v47 = vld [vmem:[%s1955_s1 + $0x48] sm:$0xff]  ;;  %v327_v48 = vld [vmem:[%s1955_s1 + $0x58] sm:$0xff] }
  0x17   :  { %v80_v52 = vsub.f32 %v76_v50, %v78_v49  ;;  %v1169_v49 = vpack.c.bf16 %v322_v43, %v320_v42  ;;  %1168 = vmatprep.subr.bf16.mxu0 %v1167_v46  ;;  %v632_v46 = vld [vmem:[%s1956_s2 + $0x18] sm:$0xff] }
  0x18   :  { %v81_v53 = vmax.f32 %v79_v51, 0.0 }
  0x19   :  { %v82_v54 = vmax.f32 %v80_v52, 0.0  ;;  %v1171_v52 = vpack.c.bf16 %v327_v48, %v325_v47  ;;  %1170 = vmatpush1.bf16.msra.mxu0 %v1169_v49  ;;  %v629_v47 = vld [vmem:[%s1956_s2] sm:$0xff]  ;;  %v631_v49 = vld [vmem:[%s1956_s2 + $0x10] sm:$0xff] }
  0x1a   :  { %v87_v55 = vadd.f32 1e-05, %v81_v53  ;;  %v324_v53 = vld [vmem:[%s1955_s1 + $0x40] sm:$0xff] }
  0x1b   :  { %v88_v56 = vadd.f32 1e-05, %v82_v54  ;;  %v326_v54 = vld [vmem:[%s1955_s1 + $0x50] sm:$0xff]  ;;  %1172 = vmatprep.subr.bf16.mxu0 %v1171_v52  ;;  %s1377_s1 = smov 28   ;;  %v1181_v52 = vpack.c.bf16 %v631_v49, %v629_v47  ;;  %v669_v49 = vld [vmem:[%s1956_s2 + $0x140] sm:$0xff] }
  0x1c   :  { %1326 = vrsqrt.f32 %v87_v55  ;;  %v1173_v60 = vpack.c.bf16 %v326_v54, %v324_v53  ;;  %v633_v54 = vld [vmem:[%s1956_s2 + $0x20] sm:$0xff] }
  0x1d   :  { %1328 = vrsqrt.f32 %v88_v56 }
  0x1e   :  { %1174 = vmatpush1.bf16.msra.mxu0 %v1173_v60  ;;  %v637_v60 = vld [vmem:[%s1956_s2 + $0x40] sm:$0xff] }
  0x1f   :  { %1176 = vmatprep.subr.bf16.mxu0 %v1175_v61  ;;  %v639_v61 = vld [vmem:[%s1956_s2 + $0x50] sm:$0xff] }
  0x26   :  { %v1327_v10 = vpop.eup %1326 }
  0x27   :  { %v1329_v12 = vpop.eup %1328  ;;  %v92_v13 = vmul.f32 %v1327_v10, %v84_v4  ;;  %v91_v14 = vmul.f32 %v1327_v10, %v83_v5 }
  0x28   :  { %v94_v15 = vmul.f32 %v1329_v12, %v86_v6  ;;  %v93_v16 = vmul.f32 %v1329_v12, %v85_v7  ;;  %v1177_v7 = vpack.c.bf16 %v330_v63, %v328_v62  ;;  %v642_v62 = vld [vmem:[%s1956_s2 + $0x68] sm:$0xff]  ;;  %v644_v63 = vld [vmem:[%s1956_s2 + $0x78] sm:$0xff] }
  0x29   :  { %v168_v17 = vrot.slane %v92_v13, %v1474_v9  ;;  %v102_v18 = vrot.slane %v91_v14, %v1474_v9  ;;  %v95_v19 = vcombine.high %v91_v14, %v1364_v8  ;;  %v161_v40 = vcombine.high %v92_v13, %v1364_v8 }
  0x2a   :  { %v183_v0 = vrot.slane %v94_v15, %v1474_v9  ;;  %v117_v3 = vrot.slane %v93_v16, %v1474_v9  ;;  %v110_v2 = vcombine.high %v93_v16, %v1364_v8  ;;  %v176_v39 = vcombine.high %v94_v15, %v1364_v8  ;;  %1178 = vmatpush1.bf16.msra.mxu0 %v1177_v7  ;;  %v643_v7 = vld [vmem:[%s1956_s2 + $0x70] sm:$0xff] }
  0x2b   :  { %v109_v28 = vrot.slane %v95_v19, %v1474_v9  ;;  %v175_v50 = vrot.slane %v161_v40, %v1474_v9 }
  0x2c   :  { %v191_v20 = vcombine.low %v168_v17, %v183_v0  ;;  %v126_v21 = vcombine.high %v102_v18, %v117_v3  ;;  %v125_v22 = vcombine.low %v102_v18, %v117_v3  ;;  %v192_v23 = vcombine.high %v168_v17, %v183_v0 }
  0x2d   :  { %v124_v29 = vrot.slane %v110_v2, %v1474_v9  ;;  %v190_v51 = vrot.slane %v176_v39, %v1474_v9 }
  0x2e   :  { %v199_v24 = vrot.slane %v191_v20, %v1478_v1  ;;  %v140_v25 = vrot.slane %v126_v21, %v1478_v1  ;;  %v1487_v26 = vrot.slane %v125_v22, %v1478_v1  ;;  %v206_v33 = vrot.slane %v192_v23, %v1478_v1 }
  0x2f   :  { %v141_v41 = vcombine.low %v109_v28, %v124_v29  ;;  %v142_v57 = vcombine.high %v109_v28, %v124_v29  ;;  %v207_v6 = vcombine.low %v175_v50, %v190_v51  ;;  %v208_v12 = vcombine.high %v175_v50, %v190_v51  ;;  %v634_v50 = vld [vmem:[%s1956_s2 + $0x28] sm:$0xff]  ;;  %v636_v51 = vld [vmem:[%s1956_s2 + $0x38] sm:$0xff] }
  0x30   :  { %256 = vrot.lane.b32.xlu1 %v199_v24, %s1367_s16  ;;  %232 = vrot.lane.b32.xlu0 %v140_v25, %s1368_s17  ;;  %v157_v34 = vcombine.high %v1487_v26, %v1364_v8  ;;  %v223_v44 = vcombine.high %v199_v24, %v1364_v8  ;;  %v158_v45 = vcombine.high %v140_v25, %v1364_v8 }
  0x31   :  { %v224_v55 = vcombine.high %v206_v33, %v1364_v8  ;;  %v149_v56 = vrot.slane %v141_v41, %v1478_v1  ;;  %v156_v5 = vrot.slane %v142_v57, %v1478_v1  ;;  %v215_v11 = vrot.slane %v207_v6, %v1478_v1  ;;  %v640_v57 = vld [vmem:[%s1956_s2 + $0x58] sm:$0xff]  ;;  %v641_v6 = vld [vmem:[%s1956_s2 + $0x60] sm:$0xff] }
  0x32   :  { %v222_v14 = vrot.slane %v208_v12, %v1478_v1  ;;  %v1183_v53 = vpack.c.bf16 %v636_v51, %v634_v50  ;;  %v1193_v12 = vpack.c.bf16 %v643_v7, %v641_v6  ;;  %v671_v50 = vld [vmem:[%s1956_s2 + $0x150] sm:$0xff]  ;;  %v674_v51 = vld [vmem:[%s1956_s2 + $0x168] sm:$0xff]  ;;  %v681_v7 = vld [vmem:[%s1956_s2 + $0x1a0] sm:$0xff] }
  0x33   :  { %v159_v4 = vcombine.high %v149_v56, %v1364_v8  ;;  %v160_v10 = vcombine.high %v156_v5, %v1364_v8  ;;  %v225_v13 = vcombine.high %v215_v11, %v1364_v8 }
  0x34   :  { %264 = vrot.lane.b32.xlu1 %v206_v33, %s1369_s26  ;;  %228 = vrot.lane.b32.xlu0 %v157_v34, %s1370_s27  ;;  %s1376_s26 = smov 24   ;;  %s1378_s27 = smov 48   ;;  %v226_v15 = vcombine.high %v222_v14, %v1364_v8 }
  0x38   :  { %236 = vrot.lane.b32.xlu1 %v158_v45, %s1371_s12  ;;  %260 = vrot.lane.b32.xlu0 %v223_v44, %s1372_s13  ;;  %v630_v45 = vld [vmem:[%s1956_s2 + $0x8] sm:$0xff] }
  0x39   :  { %v1179_v48 = vpack.c.bf16 %v632_v46, %v630_v45  ;;  %v670_v45 = vld [vmem:[%s1956_s2 + $0x148] sm:$0xff]  ;;  %v672_v46 = vld [vmem:[%s1956_s2 + $0x158] sm:$0xff] }
  0x3b   :  { %1180 = vmatprep.subr.bf16.mxu1 %v1179_v48  ;;  %v1219_v48 = vpack.c.bf16 %v672_v46, %v670_v45 }
  0x3c   :  { %268 = vrot.lane.b32.xlu0 %v224_v55, %s1373_s23  ;;  %240 = vrot.lane.b32.xlu1 %v149_v56, %s1374_s24  ;;  %v635_v55 = vld [vmem:[%s1956_s2 + $0x30] sm:$0xff]  ;;  %v638_v56 = vld [vmem:[%s1956_s2 + $0x48] sm:$0xff] }
  0x3d   :  { %1182 = vmatpush1.bf16.msra.mxu1 %v1181_v52  ;;  %v1185_v58 = vpack.c.bf16 %v635_v55, %v633_v54  ;;  %v1187_v59 = vpack.c.bf16 %v640_v57, %v638_v56  ;;  %v676_v52 = vld [vmem:[%s1956_s2 + $0x178] sm:$0xff]  ;;  %v673_v55 = vld [vmem:[%s1956_s2 + $0x160] sm:$0xff]  ;;  %v675_v56 = vld [vmem:[%s1956_s2 + $0x170] sm:$0xff] }
  0x3e   :  { %1184 = vmatprep.subr.bf16.mxu1 %v1183_v53  ;;  %v1221_v53 = vpack.c.bf16 %v671_v50, %v669_v49  ;;  %v1223_v54 = vpack.c.bf16 %v676_v52, %v674_v51  ;;  %v678_v57 = vld [vmem:[%s1956_s2 + $0x188] sm:$0xff] }
  0x40   :  { %244 = vrot.lane.b32.xlu0 %v159_v4, %s1375_s25  ;;  %248 = vrot.lane.b32.xlu1 %v156_v5, %s1376_s26  ;;  %v1189_v4 = vpack.c.bf16 %v639_v61, %v637_v60  ;;  %v1191_v5 = vpack.c.bf16 %v644_v63, %v642_v62  ;;  %v677_v61 = vld [vmem:[%s1956_s2 + $0x180] sm:$0xff]  ;;  %v679_v62 = vld [vmem:[%s1956_s2 + $0x190] sm:$0xff] }
  0x41   :  { %1186 = vmatpush1.bf16.msra.mxu1 %v1185_v58  ;;  %v680_v58 = vld [vmem:[%s1956_s2 + $0x198] sm:$0xff]  ;;  %v682_v63 = vld [vmem:[%s1956_s2 + $0x1a8] sm:$0xff] }
  0x42   :  { %1188 = vmatprep.subr.bf16.mxu1 %v1187_v59  ;;  %v1225_v59 = vpack.c.bf16 %v675_v56, %v673_v55  ;;  %v1227_v60 = vpack.c.bf16 %v680_v58, %v678_v57 }
  0x44   :  { %252 = vrot.lane.b32.xlu0 %v160_v10, %s1377_s1  ;;  %272 = vrot.lane.b32.xlu1 %v215_v11, %s1378_s27  ;;  %v646_v10 = vld [vmem:[%s1956_s2 + $0x88] sm:$0xff]  ;;  %v648_v11 = vld [vmem:[%s1956_s2 + $0x98] sm:$0xff]  ;;  %s1388_s1 = smov [#allocation2]  }
  0x45   :  { %1190 = vmatpush1.bf16.msra.mxu1 %v1189_v4  ;;  %v684_v4 = vld [vmem:[%s1956_s2 + $0x1b8] sm:$0xff] }
  0x46   :  { %1192 = vmatprep.subr.bf16.mxu1 %v1191_v5  ;;  %v1229_v5 = vpack.c.bf16 %v679_v62, %v677_v61  ;;  %v1231_v6 = vpack.c.bf16 %v684_v4, %v682_v63 }
  0x48   :  { %276 = vrot.lane.b32.xlu0 %v225_v13, %s1379_s28  ;;  %280 = vrot.lane.b32.xlu1 %v222_v14, %s1380_s29  ;;  %v1195_v13 = vpack.c.bf16 %v648_v11, %v646_v10  ;;  %v645_v14 = vld [vmem:[%s1956_s2 + $0x80] sm:$0xff]  ;;  %v683_v10 = vld [vmem:[%s1956_s2 + $0x1b0] sm:$0xff] }
  0x49   :  { %1194 = vmatpush1.bf16.msra.mxu1 %v1193_v12  ;;  %v1233_v11 = vpack.c.bf16 %v683_v10, %v681_v7 }
  0x4a   :  { %1196 = vmatprep.subr.bf16.mxu1 %v1195_v13 }
  0x4c   :  { %284 = vrot.lane.b32.xlu0 %v226_v15, %s1381_s30  ;;  %v647_v15 = vld [vmem:[%s1956_s2 + $0x90] sm:$0xff] }
  0xa2   :  { %v257_v16 = vpop.permute.xlu1 %256  ;;  %v233_v17 = vpop.permute.xlu0 %232 }
  0xa6   :  { %v265_v18 = vpop.permute.xlu1 %264  ;;  %v229_v0 = vpop.permute.xlu0 %228 }
  0xa7   :  { %v287_v19 = vsel %vm31_vm0, %v1487_v26, %v229_v0 }
  0xa8   :  { %v289_v22 = vsel %vm288_vm1, %v287_v19, %v233_v17  ;;  %v652_v17 = vld [vmem:[%s1956_s2 + $0xb8] sm:$0xff]  ;;  %v654_v19 = vld [vmem:[%s1956_s2 + $0xc8] sm:$0xff] }
  0xaa   :  { %v237_v3 = vpop.permute.xlu1 %236  ;;  %v261_v2 = vpop.permute.xlu0 %260 }
  0xab   :  { %v291_v23 = vsel %vm290_vm2, %v289_v22, %v237_v3  ;;  %v649_v3 = vld [vmem:[%s1956_s2 + $0xa0] sm:$0xff]  ;;  %vm624_vm2 = vcmask 785408  }
  0xae   :  { %v269_v20 = vpop.permute.xlu0 %268  ;;  %v241_v21 = vpop.permute.xlu1 %240 }
  0xaf   :  { %v293_v24 = vsel %vm292_vm3, %v291_v23, %v241_v21  ;;  %v653_v23 = vld [vmem:[%s1956_s2 + $0xc0] sm:$0xff]  ;;  %vm797_vm3 = vcmask 519168  }
  0xb2   :  { %v245_v25 = vpop.permute.xlu0 %244  ;;  %v249_v27 = vpop.permute.xlu1 %248 }
  0xb3   :  { %v295_v28 = vsel %vm294_vm4, %v293_v24, %v245_v25  ;;  %v655_v24 = vld [vmem:[%s1956_s2 + $0xd0] sm:$0xff]  ;;  %v658_v25 = vld [vmem:[%s1956_s2 + $0xe8] sm:$0xff] }
  0xb4   :  { %v297_v29 = vsel %vm296_vm5, %v295_v28, %v249_v27  ;;  %v660_v27 = vld [vmem:[%s1956_s2 + $0xf8] sm:$0xff]  ;;  %v1205_v28 = vpack.c.bf16 %v655_v24, %v653_v23 }
  0xb6   :  { %v253_v30 = vpop.permute.xlu0 %252  ;;  %v273_v31 = vpop.permute.xlu1 %272 }
  0xb7   :  { %v299_v26 = vsel %vm298_vm6, %v297_v29, %v253_v30  ;;  %v1207_v29 = vpack.c.bf16 %v660_v27, %v658_v25  ;;  %v657_v30 = vld [vmem:[%s1956_s2 + $0xe0] sm:$0xff]  ;;  %vm1386_vm6 = vmmov 0  }
  0xb8   :  { %v301_v32 = vsel %vm300_vm7, %v299_v26, %v257_v16  ;;  %v650_v16 = vld [vmem:[%s1956_s2 + $0xa8] sm:$0xff] }
  0xb9   :  { %v303_v33 = vsel %vm302_vm8, %v301_v32, %v261_v2  ;;  %v1199_v0 = vpack.c.bf16 %v652_v17, %v650_v16  ;;  %v651_v2 = vld [vmem:[%s1956_s2 + $0xb0] sm:$0xff]  ;;  %v662_v26 = vld [vmem:[%s1956_s2 + $0x108] sm:$0xff]  ;;  %v664_v32 = vld [vmem:[%s1956_s2 + $0x118] sm:$0xff]  ;;  %vm1093_vm8 = vcmask 33792  }
  0xba   :  { %v305_v34 = vsel %vm304_vm9, %v303_v33, %v265_v18  ;;  %v277_v35 = vpop.permute.xlu0 %276  ;;  %v281_v37 = vpop.permute.xlu1 %280  ;;  %v1197_v18 = vpack.c.bf16 %v647_v15, %v645_v14  ;;  %v1201_v21 = vpack.c.bf16 %v651_v2, %v649_v3 }
  0xbb   :  { %v307_v36 = vsel %vm306_vm10, %v305_v34, %v269_v20  ;;  %v656_v20 = vld [vmem:[%s1956_s2 + $0xd8] sm:$0xff]  ;;  %v1211_v34 = vpack.c.bf16 %v664_v32, %v662_v26 }
  0xbc   :  { %v309_v38 = vsel %vm308_vm11, %v307_v36, %v273_v31  ;;  %1198 = vmatpush1.bf16.msra.mxu1 %v1197_v18  ;;  %v1203_v22 = vpack.c.bf16 %v656_v20, %v654_v19  ;;  %v659_v31 = vld [vmem:[%s1956_s2 + $0xf0] sm:$0xff] }
  0xbd   :  { %v311_v39 = vsel %vm310_vm12, %v309_v38, %v277_v35  ;;  %1200 = vmatprep.subr.bf16.mxu1 %v1199_v0  ;;  %v1209_v33 = vpack.c.bf16 %v659_v31, %v657_v30  ;;  %v661_v35 = vld [vmem:[%s1956_s2 + $0x100] sm:$0xff]  ;;  %v663_v36 = vld [vmem:[%s1956_s2 + $0x110] sm:$0xff]  ;;  %v668_v38 = vld [vmem:[%s1956_s2 + $0x138] sm:$0xff] }
  0xbe   :  { %v313_v40 = vsel %vm312_vm13, %v311_v39, %v281_v37  ;;  %v285_v41 = vpop.permute.xlu0 %284  ;;  %v666_v37 = vld [vmem:[%s1956_s2 + $0x128] sm:$0xff]  ;;  %v1213_v39 = vpack.c.bf16 %v663_v36, %v661_v35 }
  0xbf   :  { %v315_v42 = vsel %vm314_vm14, %v313_v40, %v285_v41  ;;  %v1215_v40 = vpack.c.bf16 %v668_v38, %v666_v37  ;;  %v665_v41 = vld [vmem:[%s1956_s2 + $0x120] sm:$0xff] }
  0xc0   :  { %1109 = vmatmul.mubr.msk.f32.vlgmr.msra.gmra.mrb[0].mxu0 %vm332_vm15, %v315_v42  ;;  %1202 = vmatpush1.bf16.msra.mxu1 %v1201_v21  ;;  %v667_v42 = vld [vmem:[%s1956_s2 + $0x130] sm:$0xff] }
  0xc1   :  { %1204 = vmatprep.subr.bf16.mxu1 %v1203_v22  ;;  %v1217_v47 = vpack.c.bf16 %v667_v42, %v665_v41 }
  0xc4   :  { %1206 = vmatpush1.bf16.msra.mxu1 %v1205_v28 }
  0xc5   :  { %1208 = vmatprep.subr.bf16.mxu1 %v1207_v29 }
  0xc8   :  { %1210 = vmatpush1.bf16.msra.mxu1 %v1209_v33 }
  0xc9   :  { %1212 = vmatprep.subr.bf16.mxu1 %v1211_v34 }
  0xcc   :  { %1214 = vmatpush1.bf16.msra.mxu1 %v1213_v39 }
  0xcd   :  { %1216 = vmatprep.subr.bf16.mxu1 %v1215_v40 }
  0xd0   :  { %1218 = vmatpush1.bf16.msra.mxu1 %v1217_v47 }
  0xd1   :  { %1220 = vmatprep.subr.bf16.mxu1 %v1219_v48 }
  0xd4   :  { %1222 = vmatpush1.bf16.msra.mxu1 %v1221_v53 }
  0xd5   :  { %1224 = vmatprep.subr.bf16.mxu1 %v1223_v54 }
  0xd8   :  { %1226 = vmatpush1.bf16.msra.mxu1 %v1225_v59 }
  0xd9   :  { %1228 = vmatprep.subr.bf16.mxu1 %v1227_v60 }
  0xdc   :  { %1230 = vmatpush1.bf16.msra.mxu1 %v1229_v5 }
  0xdd   :  { %1232 = vmatprep.subr.bf16.mxu1 %v1231_v6 }
  0xe0   :  { %1234 = vmatpush1.bf16.msra.mxu1 %v1233_v11 }
 0x193   :  { %v1562_v43 = vpop.f32.mrb[0].mxu0 }
 0x194   :  { %411 = vrot.lane.b32.xlu0 %v1562_v43, %s1382_s8  ;;  %408 = vrot.lane.b32.xlu1 %v1562_v43, %s1383_s0  ;;  %v1568_v44 = vpop.f32.mrb[1].mxu0 }
 0x198   :  { %414 = vrot.lane.b32.xlu1 %v1562_v43, %s1367_s16  ;;  %418 = vrot.lane.b32.xlu0 %v1568_v44, %s1383_s0 }
 0x19c   :  { %421 = vrot.lane.b32.xlu1 %v1568_v44, %s1382_s8  ;;  %424 = vrot.lane.b32.xlu0 %v1568_v44, %s1367_s16 }
 0x206   :  { %v412_v12 = vpop.permute.xlu0 %411  ;;  %v409_v13 = vpop.permute.xlu1 %408 }
 0x207   :  { %v427_v16 = vcombine.low %v1562_v43, %v412_v12 }
 0x209   :  { %v434_v2 = vrot.slane %v427_v16, %v1474_v9 }
 0x20a   :  { %v415_v14 = vpop.permute.xlu1 %414  ;;  %v419_v15 = vpop.permute.xlu0 %418 }
 0x20b   :  { %v435_v17 = vcombine.low %v409_v13, %v415_v14 }
 0x20d   :  { %v442_v18 = vrot.slane %v435_v17, %v1474_v9 }
 0x20e   :  { %v422_v0 = vpop.permute.xlu1 %421  ;;  %v425_v3 = vpop.permute.xlu0 %424 }
 0x20f   :  { %v443_v19 = vcombine.low %v1568_v44, %v422_v0  ;;  %v451_v20 = vcombine.low %v419_v15, %v425_v3  ;;  %v459_v21 = vcombine.low %v434_v2, %v442_v18  ;;  %v686_v3 = vld [vmem:[%s1956_s2 + $0x1c8] sm:$0xff]  ;;  %v688_v2 = vld [vmem:[%s1956_s2 + $0x1d8] sm:$0xff] }
 0x211   :  { %v450_v22 = vrot.slane %v443_v19, %v1474_v9  ;;  %v458_v23 = vrot.slane %v451_v20, %v1474_v9  ;;  %v466_v25 = vrot.slane %v459_v21, %v1478_v1  ;;  %v1235_v20 = vpack.c.bf16 %v688_v2, %v686_v3  ;;  %v685_v21 = vld [vmem:[%s1956_s2 + $0x1c0] sm:$0xff] }
 0x213   :  { %v467_v24 = vcombine.low %v450_v22, %v458_v23  ;;  %v687_v22 = vld [vmem:[%s1956_s2 + $0x1d0] sm:$0xff]  ;;  %1236 = vmatprep.subr.bf16.mxu1 %v1235_v20  ;;  %v898_v20 = vld [vmem:[%s1957_s3 + $0x18] sm:$0xff] }
 0x215   :  { %v474_v43 = vrot.slane %v467_v24, %v1478_v1  ;;  %v1237_v24 = vpack.c.bf16 %v687_v22, %v685_v21  ;;  %v915_v21 = vld [vmem:[%s1957_s3 + $0xa0] sm:$0xff]  ;;  %v916_v22 = vld [vmem:[%s1957_s3 + $0xa8] sm:$0xff] }
 0x217   :  { %v475_v27 = vcombine.low %v466_v25, %v474_v43  ;;  %v476_v28 = vcombine.high %v466_v25, %v474_v43  ;;  %1238 = vmatpush1.bf16.msra.mxu1 %v1237_v24  ;;  %v1251_v24 = vpack.c.bf16 %v916_v22, %v915_v21 }
 0x219   :  { %v477_v29 = vsel %vm300_vm7, %v475_v27, 0.0  ;;  %v484_v30 = vsel %vm300_vm7, %v476_v28, 0.0  ;;  %v494_v31 = vmul.f32 %v475_v27, %v475_v27  ;;  %v495_v26 = vmul.f32 %v476_v28, %v476_v28 }
 0x21a   :  { %v478_v44 = vrot.slane %v477_v29, 4  ;;  %v485_v32 = vrot.slane %v484_v30, 4 }
 0x21b   :  { %v496_v33 = vsel %vm300_vm7, %v494_v31, 0.0  ;;  %v503_v34 = vsel %vm300_vm7, %v495_v26, 0.0  ;;  %v692_v31 = vld [vmem:[%s1956_s2 + $0x1f8] sm:$0xff] }
 0x21c   :  { %v479_v35 = vadd.f32 %v478_v44, %v477_v29  ;;  %v486_v36 = vadd.f32 %v485_v32, %v484_v30  ;;  %v497_v37 = vrot.slane %v496_v33, 4  ;;  %v504_v38 = vrot.slane %v503_v34, 4  ;;  %v690_v30 = vld [vmem:[%s1956_s2 + $0x1e8] sm:$0xff]  ;;  %v689_v32 = vld [vmem:[%s1956_s2 + $0x1e0] sm:$0xff] }
 0x21d   :  { %v1239_v44 = vpack.c.bf16 %v692_v31, %v690_v30  ;;  %v901_v31 = vld [vmem:[%s1957_s3 + $0x30] sm:$0xff] }
 0x21e   :  { %v480_v39 = vrot.slane %v479_v35, 2  ;;  %v487_v40 = vrot.slane %v486_v36, 2  ;;  %v498_v41 = vadd.f32 %v497_v37, %v496_v33  ;;  %v505_v42 = vadd.f32 %v504_v38, %v503_v34  ;;  %v691_v33 = vld [vmem:[%s1956_s2 + $0x1f0] sm:$0xff]  ;;  %s1101_s2 = sshll.u32 %s1388_s1, 4  ;;  %s1102_s2 = int_to_ptr.vmem [resolvable:$true] %s1101_s2 }
 0x21f   :  { %v1241_v37 = vpack.c.bf16 %v691_v33, %v689_v32  ;;  %1240 = vmatprep.subr.bf16.mxu1 %v1239_v44  ;;  %v919_v44 = vld [vmem:[%s1957_s3 + $0xc0] sm:$0xff]  ;;  %v920_v32 = vld [vmem:[%s1957_s3 + $0xc8] sm:$0xff]  ;;  %p1345_p1 = scmp.lt.s32.totalorder %s1102_s2, %s1102_s2 }
 0x220   :  { %v481_v45 = vadd.f32 %v480_v39, %v479_v35  ;;  %v488_v46 = vadd.f32 %v487_v40, %v486_v36  ;;  %v499_v47 = vrot.slane %v498_v41, 2  ;;  %v506_v48 = vrot.slane %v505_v42, 2 }
 0x221   :  { %1242 = vmatpush1.bf16.msra.mxu1 %v1241_v37  ;;  %v921_v37 = vld [vmem:[%s1957_s3 + $0xd0] sm:$0xff] }
 0x222   :  { %v482_v49 = vrot.slane %v481_v45, 1  ;;  %v489_v50 = vrot.slane %v488_v46, 1  ;;  %v500_v51 = vadd.f32 %v499_v47, %v498_v41  ;;  %v507_v52 = vadd.f32 %v506_v48, %v505_v42 }
 0x224   :  { %v483_v53 = vadd.f32 %v482_v49, %v481_v45  ;;  %v490_v54 = vadd.f32 %v489_v50, %v488_v46  ;;  %v501_v55 = vrot.slane %v500_v51, 1  ;;  %v508_v56 = vrot.slane %v507_v52, 1 }
 0x226   :  { %v492_v57 = vmul.f32 0.125, %v483_v53  ;;  %v493_v58 = vmul.f32 0.125, %v490_v54  ;;  %v502_v59 = vadd.f32 %v501_v55, %v500_v51  ;;  %v509_v60 = vadd.f32 %v508_v56, %v507_v52 }
 0x228   :  { %v510_v61 = vmul.f32 0.125, %v502_v59  ;;  %v511_v62 = vmul.f32 0.125, %v509_v60  ;;  %v512_v63 = vmul.f32 %v492_v57, %v492_v57  ;;  %v513_v4 = vmul.f32 %v493_v58, %v493_v58 }
 0x229   :  { %v518_v13 = vsub.f32 %v475_v27, %v492_v57  ;;  %v519_v15 = vsub.f32 %v476_v28, %v493_v58 }
 0x22a   :  { %v514_v5 = vsub.f32 %v510_v61, %v512_v63  ;;  %v515_v6 = vsub.f32 %v511_v62, %v513_v4 }
 0x22c   :  { %v516_v7 = vmax.f32 %v514_v5, 0.0  ;;  %v517_v10 = vmax.f32 %v515_v6, 0.0 }
 0x22e   :  { %v520_v11 = vadd.f32 1e-05, %v516_v7  ;;  %v521_v12 = vadd.f32 1e-05, %v517_v10 }
 0x230   :  { %1330 = vrsqrt.f32 %v520_v11 }
 0x231   :  { %1332 = vrsqrt.f32 %v521_v12 }
 0x23a   :  { %v1331_v14 = vpop.eup %1330 }
 0x23b   :  { %v1333_v16 = vpop.eup %1332  ;;  %v524_v17 = vmul.f32 %v1331_v14, %v518_v13  ;;  %v911_v13 = vld [vmem:[%s1957_s3 + $0x80] sm:$0xff]  ;;  %v912_v14 = vld [vmem:[%s1957_s3 + $0x88] sm:$0xff] }
 0x23c   :  { %v525_v18 = vmul.f32 %v1333_v16, %v519_v15  ;;  %v895_v15 = vld [vmem:[%s1957_s3] sm:$0xff]  ;;  %v1243_v16 = vpack.c.bf16 %v912_v14, %v911_v13 }
 0x23d   :  { %vm526_vm0 = vcmp.ge.f32.partialorder %v524_v17, 0.0  ;;  %v528_v0 = vmul.f32 0.01, %v524_v17 }
 0x23e   :  { %vm527_vm1 = vcmp.ge.f32.partialorder %v525_v18, 0.0  ;;  %v529_v19 = vmul.f32 0.01, %v525_v18  ;;  %1244 = vmatprep.subr.bf16.mxu0 %v1243_v16 }
 0x23f   :  { %v530_v23 = vsel %vm526_vm0, %v524_v17, %v528_v0  ;;  %v896_v17 = vld [vmem:[%s1957_s3 + $0x8] sm:$0xff]  ;;  %v914_v0 = vld [vmem:[%s1957_s3 + $0x98] sm:$0xff] }
 0x240   :  { %v531_v25 = vsel %vm527_vm1, %v525_v18, %v529_v19  ;;  %v532_v43 = vcombine.high %v530_v23, %v1364_v8  ;;  %v539_v27 = vrot.slane %v530_v23, %v1474_v9  ;;  %v913_v18 = vld [vmem:[%s1957_s3 + $0x90] sm:$0xff]  ;;  %v1245_v3 = vpack.c.bf16 %v896_v17, %v895_v15 }
 0x241   :  { %v547_v28 = vcombine.high %v531_v25, %v1364_v8  ;;  %v554_v29 = vrot.slane %v531_v25, %v1474_v9  ;;  %v1247_v2 = vpack.c.bf16 %v914_v0, %v913_v18  ;;  %v897_v19 = vld [vmem:[%s1957_s3 + $0x10] sm:$0xff]  ;;  %v899_v25 = vld [vmem:[%s1957_s3 + $0x20] sm:$0xff] }
 0x242   :  { %v546_v26 = vrot.slane %v532_v43, %v1474_v9  ;;  %1246 = vmatpush3.bf16.msra.mxu0 %v1245_v3  ;;  %v1249_v23 = vpack.c.bf16 %v898_v20, %v897_v19  ;;  %v900_v43 = vld [vmem:[%s1957_s3 + $0x28] sm:$0xff] }
 0x243   :  { %v561_v34 = vrot.slane %v547_v28, %v1474_v9  ;;  %v563_v35 = vcombine.high %v539_v27, %v554_v29  ;;  %v562_v36 = vcombine.low %v539_v27, %v554_v29  ;;  %1248 = vmatprep.subr.bf16.mxu0 %v1247_v2  ;;  %v917_v27 = vld [vmem:[%s1957_s3 + $0xb0] sm:$0xff]  ;;  %v918_v28 = vld [vmem:[%s1957_s3 + $0xb8] sm:$0xff]  ;;  %v1253_v29 = vpack.c.bf16 %v900_v43, %v899_v25 }
 0x244   :  { %v1255_v30 = vpack.c.bf16 %v918_v28, %v917_v27 }
 0x245   :  { %v577_v38 = vrot.slane %v563_v35, %v1478_v1  ;;  %v579_v39 = vcombine.high %v546_v26, %v561_v34  ;;  %v570_v40 = vrot.slane %v562_v36, %v1478_v1  ;;  %v578_v41 = vcombine.low %v546_v26, %v561_v34  ;;  %v902_v26 = vld [vmem:[%s1957_s3 + $0x38] sm:$0xff]  ;;  %v903_v35 = vld [vmem:[%s1957_s3 + $0x40] sm:$0xff]  ;;  %v904_v36 = vld [vmem:[%s1957_s3 + $0x48] sm:$0xff] }
 0x246   :  { %1250 = vmatpush3.bf16.msra.mxu0 %v1249_v23  ;;  %v1257_v33 = vpack.c.bf16 %v902_v26, %v901_v31  ;;  %v1259_v34 = vpack.c.bf16 %v920_v32, %v919_v44 }
 0x247   :  { %v593_v42 = vrot.slane %v579_v39, %v1478_v1  ;;  %v586_v45 = vrot.slane %v578_v41, %v1478_v1  ;;  %v594_v46 = vcombine.high %v570_v40, %v1364_v8  ;;  %v595_v49 = vcombine.high %v577_v38, %v1364_v8  ;;  %1252 = vmatprep.subr.bf16.mxu0 %v1251_v24  ;;  %v905_v41 = vld [vmem:[%s1957_s3 + $0x50] sm:$0xff] }
 0x248   :  { %v1261_v39 = vpack.c.bf16 %v904_v36, %v903_v35 }
 0x249   :  { %v1306_v47 = vpack.i.bf16 %v577_v38, %v593_v42  ;;  %v596_v48 = vcombine.high %v586_v45, %v1364_v8  ;;  %v597_v50 = vcombine.high %v593_v42, %v1364_v8  ;;  %v922_v38 = vld [vmem:[%s1957_s3 + $0xd8] sm:$0xff] }
 0x24a   :  { %1254 = vmatpush3.bf16.msra.mxu0 %v1253_v29  ;;  %v906_v42 = vld [vmem:[%s1957_s3 + $0x58] sm:$0xff] }
 0x24b   :  { %1307 = vrot.lane.b32.xlu0 %v1306_v47, %s1382_s8  ;;  %v1311_v51 = vpack.i.bf16 %v594_v46, %v596_v48  ;;  %v1316_v52 = vpack.i.bf16 %v595_v49, %v597_v50  ;;  %1256 = vmatprep.subr.bf16.mxu0 %v1255_v30  ;;  %v924_v46 = vld [vmem:[%s1957_s3 + $0xe8] sm:$0xff]  ;;  %v1265_v47 = vpack.c.bf16 %v906_v42, %v905_v41  ;;  %v907_v49 = vld [vmem:[%s1957_s3 + $0x60] sm:$0xff] }
 0x24c   :  { %v908_v50 = vld [vmem:[%s1957_s3 + $0x68] sm:$0xff] }
 0x24d   :  { %1312 = vrot.lane.b32.xlu1 %v1311_v51, %s1367_s16  ;;  %v1269_v51 = vpack.c.bf16 %v908_v50, %v907_v49  ;;  %v926_v49 = vld [vmem:[%s1957_s3 + $0xf8] sm:$0xff] }
 0x24e   :  { %1258 = vmatpush3.bf16.msra.mxu0 %v1257_v33 }
 0x24f   :  { %1260 = vmatprep.subr.bf16.mxu0 %v1259_v34 }
 0x251   :  { %1317 = vrot.lane.b32.xlu1 %v1316_v52, %s1383_s0 }
 0x252   :  { %1262 = vmatpush3.bf16.msra.mxu0 %v1261_v39 }
 0x2bd   :  { %v1308_v54 = vpop.permute.xlu0 %1307 }
 0x2be   :  { %v1310_v59 = vunpack.i.h.bf16 %v1308_v54  ;;  %v1309_v60 = vunpack.i.l.bf16 %v1308_v54 }
 0x2bf   :  { %v1313_v53 = vpop.permute.xlu1 %1312 }
 0x2c0   :  { %v1315_v55 = vunpack.i.h.bf16 %v1313_v53  ;;  %v1314_v56 = vunpack.i.l.bf16 %v1313_v53 }
 0x2c2   :  { %v626_v57 = vsel %vm300_vm7, %v586_v45, %v1314_v56  ;;  %v622_v58 = vsel %vm300_vm7, %v570_v40, %v1315_v55  ;;  %v1263_v40 = vpack.c.bf16 %v922_v38, %v921_v37  ;;  %v923_v45 = vld [vmem:[%s1957_s3 + $0xe0] sm:$0xff] }
 0x2c3   :  { %v1318_v61 = vpop.permute.xlu1 %1317  ;;  %v627_v4 = vsel %vm332_vm15, %v626_v57, %v1309_v60  ;;  %v623_v5 = vsel %vm332_vm15, %v622_v58, %v1310_v59  ;;  %v1267_v48 = vpack.c.bf16 %v924_v46, %v923_v45 }
 0x2c4   :  { %v1320_v62 = vunpack.i.h.bf16 %v1318_v61  ;;  %v1319_v63 = vunpack.i.l.bf16 %v1318_v61  ;;  %1264 = vmatprep.subr.bf16.mxu0 %v1263_v40 }
 0x2c5   :  { %1266 = vmatpush3.bf16.msra.mxu0 %v1265_v47 }
 0x2c6   :  { %v628_v6 = vsel %vm624_vm2, %v627_v4, %v1319_v63  ;;  %v625_v7 = vsel %vm624_vm2, %v623_v5, %v1320_v62  ;;  %1268 = vmatprep.subr.bf16.mxu0 %v1267_v48  ;;  %v925_v48 = vld [vmem:[%s1957_s3 + $0xf0] sm:$0xff] }
 0x2c7   :  { %757 = vmatprep.mubr.f32.mxu1 %v628_v6  ;;  %v1271_v50 = vpack.c.bf16 %v926_v49, %v925_v48 }
 0x2c8   :  { %758 = vmatmul.mubr.f32.vlgmr.msra.gmra.mrb[0].mxu1 %v625_v7 }
 0x2c9   :  { %1270 = vmatpush3.bf16.msra.mxu0 %v1269_v51  ;;  %v909_v51 = vld [vmem:[%s1957_s3 + $0x70] sm:$0xff] }
 0x2ca   :  { %1272 = vmatprep.subr.bf16.mxu0 %v1271_v50 }
 0x39b   :  { %v1803_v10 = vpop.f32.mrb[0].mxu1 }
 0x39c   :  { %765 = vrot.lane.b32.xlu0 %v1803_v10, %s1382_s8  ;;  %v1807_v11 = vpop.f32.mrb[1].mxu1 }
 0x39d   :  { %v772_v12 = vcombine.low %v1803_v10, %v1807_v11  ;;  %769 = vrot.lane.b32.xlu1 %v1807_v11, %s1382_s8 }
 0x39f   :  { %v779_v55 = vrot.slane %v772_v12, %v1474_v9 }
 0x40e   :  { %v766_v52 = vpop.permute.xlu0 %765 }
 0x40f   :  { %v770_v53 = vpop.permute.xlu1 %769 }
 0x410   :  { %v780_v54 = vcombine.low %v766_v52, %v770_v53  ;;  %v910_v52 = vld [vmem:[%s1957_s3 + $0x78] sm:$0xff] }
 0x412   :  { %v787_v56 = vrot.slane %v780_v54, %v1474_v9 }
 0x414   :  { %v788_v57 = vcombine.low %v779_v55, %v787_v56  ;;  %v1273_v55 = vpack.c.bf16 %v910_v52, %v909_v51 }
 0x416   :  { %v795_v58 = vrot.slane %v788_v57, %v1478_v1  ;;  %1274 = vmatpush3.bf16.msra.mxu0 %v1273_v55 }
 0x418   :  { %v796_v59 = vcombine.high %v795_v58, %v1364_v8  ;;  %v798_v60 = vsel %vm797_vm3, %v795_v58, 0.0  ;;  %v815_v61 = vmul.f32 %v795_v58, %v795_v58 }
 0x419   :  { %v799_v62 = vrot.slane %v798_v60, 4 }
 0x41a   :  { %v805_v63 = vsel %vm797_vm3, %v796_v59, 0.0  ;;  %v816_v4 = vmul.f32 %v796_v59, %v796_v59  ;;  %v817_v5 = vsel %vm797_vm3, %v815_v61, 0.0 }
 0x41b   :  { %v800_v6 = vadd.f32 %v799_v62, %v798_v60  ;;  %v806_v7 = vrot.slane %v805_v63, 4  ;;  %v818_v10 = vrot.slane %v817_v5, 4 }
 0x41c   :  { %v824_v11 = vsel %vm797_vm3, %v816_v4, 0.0 }
 0x41d   :  { %v801_v13 = vrot.slane %v800_v6, 2  ;;  %v807_v12 = vadd.f32 %v806_v7, %v805_v63  ;;  %v819_v14 = vadd.f32 %v818_v10, %v817_v5  ;;  %v825_v15 = vrot.slane %v824_v11, 4 }
 0x41f   :  { %v802_v16 = vadd.f32 %v801_v13, %v800_v6  ;;  %v808_v17 = vrot.slane %v807_v12, 2  ;;  %v820_v18 = vrot.slane %v819_v14, 2  ;;  %v826_v0 = vadd.f32 %v825_v15, %v824_v11 }
 0x420   :  { %v1385_v15 = vmov 0.0|0.0  }
 0x421   :  { %v803_v3 = vrot.slane %v802_v16, 1  ;;  %v809_v2 = vadd.f32 %v808_v17, %v807_v12  ;;  %v821_v19 = vadd.f32 %v820_v18, %v819_v14  ;;  %v827_v20 = vrot.slane %v826_v0, 2  ;;  %v1014_v12 = vld [vmem:[%s1959_s5 + $0x8] sm:$0xff]  ;;  %v1015_v14 = vld [vmem:[%s1959_s5 + $0x10] sm:$0xff]  ;;  %1275 = vmatprep.subr.bf16.mxu0 %v1385_v15  ;;  %v1016_v17 = vld [vmem:[%s1959_s5 + $0x18] sm:$0xff] }
 0x422   :  { %v1279_v18 = vpack.c.bf16 %v1016_v17, %v1015_v14 }
 0x423   :  { %v804_v21 = vadd.f32 %v803_v3, %v802_v16  ;;  %v810_v22 = vrot.slane %v809_v2, 1  ;;  %v822_v23 = vrot.slane %v821_v19, 1  ;;  %v828_v24 = vadd.f32 %v827_v20, %v826_v0  ;;  %v1110_v3 = vld [vmem:[%s1958_s4] ss:$0 sm:$0xff]  ;;  %s1340_s4 = scalar_lea.vmem %s1102_s2, 32 }
 0x424   :  { %p1341_p0 = scmp.ne.s32.totalorder %s1102_s2, %s1340_s4  ;;  %p1346_p2 = scmp.lt.s32.totalorder %s1340_s4, %s1340_s4 }
 0x425   :  { %v811_v25 = vadd.f32 %v810_v22, %v809_v2  ;;  %v813_v43 = vmul.f32 0.25, %v804_v21  ;;  %v823_v27 = vadd.f32 %v822_v23, %v821_v19  ;;  %v829_v28 = vrot.slane %v828_v24, 1 }
 0x426   :  { %p1347_p3 = por %p1346_p2, %p1345_p1 }
 0x427   :  { %v814_v29 = vmul.f32 0.25, %v811_v25  ;;  %v830_v30 = vadd.f32 %v829_v28, %v828_v24  ;;  %v831_v31 = vmul.f32 0.25, %v823_v27  ;;  %v833_v26 = vmul.f32 %v813_v43, %v813_v43 }
 0x428   :  { %v839_v39 = vsub.f32 %v795_v58, %v813_v43  ;;  %p1348_p4 = pnand %p1347_p3, %p1341_p0 }
 0x429   :  { %v832_v44 = vmul.f32 0.25, %v830_v30  ;;  %v834_v32 = vmul.f32 %v814_v29, %v814_v29  ;;  %v835_v33 = vsub.f32 %v831_v31, %v833_v26  ;;  %v840_v41 = vsub.f32 %v796_v59, %v814_v29  ;;  %v1007_v59 = vld [vmem:[%s1960_s6] sm:$0x3] }
 0x42a   :  { %1009 = vrot.lane.b32.xlu1 %v1007_v59, %s1384_s19 }
 0x42b   :  { %v836_v34 = vsub.f32 %v832_v44, %v834_v32  ;;  %v837_v35 = vmax.f32 %v835_v33, 0.0 }
 0x42d   :  { %v838_v36 = vmax.f32 %v836_v34, 0.0  ;;  %v841_v37 = vadd.f32 1e-05, %v837_v35 }
 0x42f   :  { %v842_v38 = vadd.f32 1e-05, %v838_v36  ;;  %1334 = vrsqrt.f32 %v841_v37 }
 0x431   :  { %1336 = vrsqrt.f32 %v842_v38 }
 0x439   :  { %v1335_v40 = vpop.eup %1334 }
 0x43a   :  { %v845_v42 = vmul.f32 %v1335_v40, %v839_v39 }
 0x43b   :  { %v1337_v45 = vpop.eup %1336 }
 0x43c   :  { %v846_v46 = vmul.f32 %v1337_v45, %v840_v41  ;;  %vm847_vm4 = vcmp.ge.f32.partialorder %v845_v42, 0.0  ;;  %v849_v47 = vmul.f32 0.01, %v845_v42 }
 0x43e   :  { %vm848_vm5 = vcmp.ge.f32.partialorder %v846_v46, 0.0  ;;  %v850_v53 = vmul.f32 0.01, %v846_v46  ;;  %v851_v54 = vsel %vm847_vm4, %v845_v42, %v849_v47 }
 0x43f   :  { %v858_v57 = vrot.slane %v851_v54, %v1474_v9 }
 0x440   :  { %v859_v56 = vsel %vm848_vm5, %v846_v46, %v850_v53 }
 0x441   :  { %v866_v58 = vrot.slane %v859_v56, %v1474_v9 }
 0x443   :  { %v867_v60 = vcombine.low %v858_v57, %v866_v58  ;;  %v868_v61 = vcombine.high %v858_v57, %v866_v58 }
 0x445   :  { %v875_v62 = vrot.slane %v867_v60, %v1478_v1  ;;  %v882_v63 = vrot.slane %v868_v61, %v1478_v1  ;;  %v1013_v1 = vld [vmem:[%s1959_s5] sm:$0xff]  ;;  %s1387_s5 = smov 123  }
 0x446   :  { %v1276_v16 = vpack.c.bf16 %v1014_v12, %v1013_v1 }
 0x447   :  { %v883_v4 = vcombine.high %v875_v62, %v1364_v8  ;;  %v884_v5 = vcombine.high %v882_v63, %v1364_v8 }
 0x449   :  { %v1321_v6 = vpack.i.bf16 %v883_v4, %v884_v5 }
 0x44b   :  { %1322 = vrot.lane.b32.xlu0 %v1321_v6, %s1382_s8 }
 0x49c   :  { %v1010_v23 = vpop.permute.xlu1 %1009 }
 0x4bd   :  { %v1323_v9 = vpop.permute.xlu0 %1322 }
 0x4be   :  { %v1325_v7 = vunpack.i.h.bf16 %v1323_v9  ;;  %v1324_v10 = vunpack.i.l.bf16 %v1323_v9 }
 0x4c0   :  { %v894_v11 = vsel %vm332_vm15, %v882_v63, %v1324_v10  ;;  %v893_v13 = vsel %vm332_vm15, %v875_v62, %v1325_v7 }
 0x4c1   :  { %998 = vmatprep.mubr.f32.mxu0 %v894_v11 }
 0x4c2   :  { %999 = vmatmul.mubr.f32.vlgmr.msra.gmra.mrb[2].mxu0 %v893_v13 }
 0x4c3   :  { %1160 = vmatprep.mubr.msk.f32.mxu0 %vm1386_vm6, %v1364_v8  ;;  %1277 = vmatpush3.bf16.msra.mxu0 %v1276_v16 }
 0x4c4   :  { %1278 = vmatprep.subr.bf16.mxu0 %v1385_v15 }
 0x4c7   :  { %1280 = vmatpush3.bf16.msra.mxu0 %v1279_v18 }
 0x595   :  { %v1144_v0 = vpop.f32.mrb[2].mxu0 }
 0x596   :  { %v1145_v2 = vpop.f32.mrb[3].mxu0 }
 0x597   :  { %v1146_v19 = vadd.f32 %v1145_v2, %v1144_v0 }
 0x599   :  { %v1001_v20 = vadd.f32 %v1146_v19, %v1110_v3 }
 0x59b   :  { %v1004_v21 = vmul.f32 0.5, %v1001_v20 }
 0x59d   :  { %v1005_v22 = vmul.f32 1.442695, %v1004_v21 }
 0x59f   :  { %1338 = vpow2.f32 %v1005_v22 }
 0x5a9   :  { %v1339_v24 = vpop.eup %1338 }
 0x5aa   :  { %v1012_v25 = vmul.f32 %v1339_v24, %v1010_v23 }
 0x5ac   :  { %1018 = vrot.lane.b32.xlu0 %v1012_v25, %s1387_s5 }
 0x61e   :  { %v1019_v8 = vpop.permute.xlu0 %1018 }
 0x61f   :  { %1161 = vmatmul.mubr.msk.f32.vlgmr.msra.gmra.mrb[4].mxu0 %vm300_vm7, %v1019_v8 }
 0x6f2   :  { %v1088_v43 = vpop.f32.mrb[4].mxu0 }
 0x6f3   :  { %v1092_v27 = vadd.f32 %v1088_v43, %v1001_v20  ;;  %v1162_v28 = vpop.f32.mrb[5].mxu0 }
 0x6f5   :  { %1094 = vst.msk [vmem:[#allocation2] sm:$0x3] %vm1093_vm8, %v1092_v27 }
 0x6f6   :  { %1351 = shalt.err (!%p1348_p4)
}
 0x6f7   :  { %s1352_s27 = scalar_lea.hbm %s1961_s7, 32 }
 0x6f8   :  { %p1353_p5 = scmp.ne.s32.totalorder %s1961_s7, %s1352_s27  ;;  %p1356_p6 = scmp.lt.u32.totalorder %s1352_s27, %s1961_s7 }
 0x6fa   :  { %p1358_p7 = pnand %p1356_p6, %p1353_p5 }
 0x6fc   :  { %1361 = shalt.err (!%p1358_p7)
}
 0x6fd   :  { %1104 = dma.vmem_to_hbm [thread:$0]  %s1102_s2, 32, %s1961_s7, [#allocation3]  }
 0x6fe   :  { %1362 = dma.done.wait [#allocation3], 32  }
 0x6ff   :  { %1363 = vsyncadd [#allocation3], 4294967264 }
 0x700   :  { %1108 = vsyncpa [#allocation3], 1 }

</bundles_post_ra>
